<compile_context>
chip_gen: v7x
topology: tpu7x:2x2x1
jax: 0.10.0
libtpu: 0.0.40
codegen_flags: <defaults>
</compile_context>

<pallas_src>
import jax
import jax.numpy as jnp
from jax.experimental import pallas as pl
from jax.experimental.pallas import tpu as pltpu


def _round_up(x: int, m: int) -> int:
    return ((x + m - 1) // m) * m


def value_head_kernel(x_ref, w1_ref, b1_ref, w2_ref, b2_ref, w3_ref, b3_ref,
                      o_ref):
    x = x_ref[...]

    # fc1 + ReLU   (dropout = identity in eval mode)
    h1 = jnp.dot(x, w1_ref[...], preferred_element_type=jnp.float32)
    h1 = jnp.maximum(h1 + b1_ref[...], 0.0)

    # fc2 + ReLU
    h2 = jnp.dot(h1, w2_ref[...], preferred_element_type=jnp.float32)
    h2 = jnp.maximum(h2 + b2_ref[...], 0.0)

    # fc3 + Tanh: out_features == 1 -> mul + cross-lane reduce (VPU+XLU),
    # avoids an N=1 MXU matmul and keeps the writeback to a single column.
    h3 = jnp.sum(h2 * w3_ref[...], axis=-1, keepdims=True) + b3_ref[...]
    o_ref[...] = jnp.tanh(h3).astype(o_ref.dtype)


_TB_MAX = 1024                      # amortize ~0.35us/step grid overhead
_VMEM_BUDGET = 8 * 1024 * 1024      # conservative: fits v5e 16MiB scoped default


@jax.jit
def value_head_forward(x, pp):
    """x: (B, input_dims) float32, pp: prepared (padded) params. Returns (B, 1)."""
    x = x.astype(jnp.float32)
    B, D = x.shape
    H1p = pp["w1"].shape[1]
    H2p = pp["w2"].shape[1]

    # VMEM budget: resident weights/biases + double-buffered x tile (+ output).
    weight_bytes = 4 * (D * H1p + H1p + H1p * H2p + H2p + H2p + 1)
    stream_budget = max(_VMEM_BUDGET - weight_bytes, 64 * 1024)
    tb_budget = max(8, (stream_budget // (2 * (D + 1) * 4)) // 8 * 8)
    tb_cap = min(_TB_MAX, tb_budget)

    # Balanced tiles: waste < 8 rows of padding instead of up to TB-1 rows.
    Bp8 = _round_up(B, 8)
    n_tiles = -(-Bp8 // tb_cap)
    TB = _round_up(-(-Bp8 // n_tiles), 8)
    Bp = TB * n_tiles

    # Only the batch dim is padded (cheap); feature dim stays unpadded.
    xp = x if Bp == B else jnp.zeros((Bp, D), jnp.float32).at[:B].set(x)

    out = pl.pallas_call(
        value_head_kernel,
        out_shape=jax.ShapeDtypeStruct((Bp, 1), jnp.float32),
        grid=(n_tiles,),
        in_specs=[
            pl.BlockSpec((TB, D), lambda i: (i, 0)),     # x: streamed per tile
            pl.BlockSpec((D, H1p), lambda i: (0, 0)),    # weights/biases resident
            pl.BlockSpec((1, H1p), lambda i: (0, 0)),
            pl.BlockSpec((H1p, H2p), lambda i: (0, 0)),
            pl.BlockSpec((1, H2p), lambda i: (0, 0)),
            pl.BlockSpec((1, H2p), lambda i: (0, 0)),    # w3 as a row vector
            pl.BlockSpec((1, 1), lambda i: (0, 0)),      # b3 scalar
        ],
        out_specs=pl.BlockSpec((TB, 1), lambda i: (i, 0)),
        compiler_params=pltpu.CompilerParams(
            dimension_semantics=("parallel",)),          # megacore shard on v7x
    )(xp, pp["w1"], pp["b1"], pp["w2"], pp["b2"], pp["w3"], pp["b3"])

    return out[:B]


def prepare_params(params):
    """One-time 128-lane padding of the tiny weights/biases, done OUTSIDE the
    jitted forward so no padded copies are materialized per call."""
    w1, b1 = params["w1"], params["b1"]
    w2, b2 = params["w2"], params["b2"]
    w3, b3 = params["w3"], params["b3"]
    D, H1 = w1.shape
    H2 = w2.shape[1]
    H1p = _round_up(H1, 128)
    H2p = _round_up(H2, 128)
    return {
        "w1": jnp.zeros((D, H1p), jnp.float32).at[:, :H1].set(w1),
        "b1": jnp.zeros((1, H1p), jnp.float32).at[:, :H1].set(b1[None, :]),
        "w2": jnp.zeros((H1p, H2p), jnp.float32).at[:H1, :H2].set(w2),
        "b2": jnp.zeros((1, H2p), jnp.float32).at[:, :H2].set(b2[None, :]),
        "w3": jnp.zeros((1, H2p), jnp.float32).at[:, :H2].set(w3[:, 0][None, :]),
        "b3": b3.reshape(1, 1).astype(jnp.float32),
    }


def init_params(key, input_dims):
    """Deterministic synthetic init matching nn.Linear shapes.
    Weights are stored transposed relative to PyTorch: (in, out)."""
    ks = jax.random.split(key, 6)

    def lin(kw, kb, fan_in, fan_out):
        bound = 1.0 / jnp.sqrt(fan_in)
        w = jax.random.uniform(kw, (fan_in, fan_out), jnp.float32, -bound, bound)
        b = jax.random.uniform(kb, (fan_out,), jnp.float32, -bound, bound)
        return w, b

    w1, b1 = lin(ks[0], ks[1], input_dims, 36)
    w2, b2 = lin(ks[2], ks[3], 36, 18)
    w3, b3 = lin(ks[4], ks[5], 18, 1)
    return {"w1": w1, "b1": b1, "w2": w2, "b2": b2, "w3": w3, "b3": b3}


def reference_forward(x, p):
    h = jnp.maximum(x @ p["w1"] + p["b1"], 0.0)
    h = jnp.maximum(h @ p["w2"] + p["b2"], 0.0)
    return jnp.tanh(h @ p["w3"] + p["b3"])


if __name__ == "__main__":
    key = jax.random.PRNGKey(0)
    k_params, k_x1, k_x2 = jax.random.split(key, 3)

    input_dims = 32
    params = init_params(k_params, input_dims)
    pparams = prepare_params(params)

    # Small batch (single grid tile, batch padded 2 -> 8).
    x_small = jax.random.normal(k_x1, (2, input_dims), jnp.float32)
    out_small = jax.block_until_ready(value_head_forward(x_small, pparams))
    ref_small = reference_forward(x_small, params)
    assert out_small.shape == (2, 1), out_small.shape
    assert jnp.allclose(out_small, ref_small, atol=1e-5, rtol=1e-5), (
        out_small, ref_small)

    # Larger batch: exercises the multi-tile grid (grid=(2,), TB=528) and the
    # balanced ragged-last-tile padding path (1040 -> 1056).
    x_big = jax.random.normal(k_x2, (1040, input_dims), jnp.float32)
    out_big = jax.block_until_ready(value_head_forward(x_big, pparams))
    ref_big = reference_forward(x_big, params)
    assert out_big.shape == (1040, 1), out_big.shape
    assert jnp.allclose(out_big, ref_big, atol=1e-5, rtol=1e-5)

    print("KERNEL_OK")
</pallas_src>

<mosaic_0001>
module attributes {stable_mosaic.version = 11 : i64} {
  func.func @value_head_kernel(%arg0: i32, %arg1: memref<8x32xf32, #tpu.memory_space<vmem>>, %arg2: memref<32x128xf32, #tpu.memory_space<vmem>>, %arg3: memref<1x128xf32, #tpu.memory_space<vmem>>, %arg4: memref<128x128xf32, #tpu.memory_space<vmem>>, %arg5: memref<1x128xf32, #tpu.memory_space<vmem>>, %arg6: memref<1x128xf32, #tpu.memory_space<vmem>>, %arg7: memref<1x1xf32, #tpu.memory_space<vmem>>, %arg8: memref<8x1xf32, #tpu.memory_space<vmem>>) attributes {dimension_semantics = [#tpu.dimension_semantics<parallel>], iteration_bounds = array<i64: 1>, scalar_prefetch = 0 : i64, scratch_operands = 0 : i64, tpu.core_type = #tpu.core_type<tc>, window_params = [{transform_indices = @transform_0, window_bounds = array<i64: 8, 32>}, {pipeline_mode = #tpu.pipeline_mode<synchronous>, transform_indices = @transform_1, window_bounds = array<i64: 32, 128>}, {pipeline_mode = #tpu.pipeline_mode<synchronous>, transform_indices = @transform_2, window_bounds = array<i64: 1, 128>}, {pipeline_mode = #tpu.pipeline_mode<synchronous>, transform_indices = @transform_3, window_bounds = array<i64: 128, 128>}, {pipeline_mode = #tpu.pipeline_mode<synchronous>, transform_indices = @transform_4, window_bounds = array<i64: 1, 128>}, {pipeline_mode = #tpu.pipeline_mode<synchronous>, transform_indices = @transform_5, window_bounds = array<i64: 1, 128>}, {pipeline_mode = #tpu.pipeline_mode<synchronous>, transform_indices = @transform_6, window_bounds = array<i64: 1, 1>}, {transform_indices = @transform_7, window_bounds = array<i64: 8, 1>}]} {
    %c0 = arith.constant 0 : index
    %c0_0 = arith.constant 0 : index
    %0 = vector.load %arg1[%c0, %c0_0] : memref<8x32xf32, #tpu.memory_space<vmem>>, vector<8x32xf32>
    %c0_1 = arith.constant 0 : index
    %c0_2 = arith.constant 0 : index
    %1 = vector.load %arg2[%c0_1, %c0_2] : memref<32x128xf32, #tpu.memory_space<vmem>>, vector<32x128xf32>
    %cst = arith.constant dense<0.000000e+00> : vector<8x128xf32>
    %2 = tpu.matmul %0, %1, %cst {dimension_numbers = #tpu.dot_dimension_numbers<[1], [0], [0], [1], [0, 0, 1, 1], [], []>} : vector<8x32xf32>, vector<32x128xf32>, vector<8x128xf32> -> vector<8x128xf32>
    %c0_3 = arith.constant 0 : index
    %c0_4 = arith.constant 0 : index
    %3 = vector.load %arg3[%c0_3, %c0_4] : memref<1x128xf32, #tpu.memory_space<vmem>>, vector<1x128xf32>
    %4 = vector.broadcast %3 : vector<1x128xf32> to vector<8x128xf32>
    %5 = arith.addf %2, %4 : vector<8x128xf32>
    %cst_5 = arith.constant 0.000000e+00 : f32
    %6 = vector.broadcast %cst_5 : f32 to vector<8x128xf32>
    %7 = arith.maximumf %5, %6 : vector<8x128xf32>
    %c0_6 = arith.constant 0 : index
    %c0_7 = arith.constant 0 : index
    %8 = vector.load %arg4[%c0_6, %c0_7] : memref<128x128xf32, #tpu.memory_space<vmem>>, vector<128x128xf32>
    %cst_8 = arith.constant dense<0.000000e+00> : vector<8x128xf32>
    %9 = tpu.matmul %7, %8, %cst_8 {dimension_numbers = #tpu.dot_dimension_numbers<[1], [0], [0], [1], [0, 0, 1, 1], [], []>} : vector<8x128xf32>, vector<128x128xf32>, vector<8x128xf32> -> vector<8x128xf32>
    %c0_9 = arith.constant 0 : index
    %c0_10 = arith.constant 0 : index
    %10 = vector.load %arg5[%c0_9, %c0_10] : memref<1x128xf32, #tpu.memory_space<vmem>>, vector<1x128xf32>
    %11 = vector.broadcast %10 : vector<1x128xf32> to vector<8x128xf32>
    %12 = arith.addf %9, %11 : vector<8x128xf32>
    %cst_11 = arith.constant 0.000000e+00 : f32
    %13 = vector.broadcast %cst_11 : f32 to vector<8x128xf32>
    %14 = arith.maximumf %12, %13 : vector<8x128xf32>
    %c0_12 = arith.constant 0 : index
    %c0_13 = arith.constant 0 : index
    %15 = vector.load %arg6[%c0_12, %c0_13] : memref<1x128xf32, #tpu.memory_space<vmem>>, vector<1x128xf32>
    %16 = vector.broadcast %15 : vector<1x128xf32> to vector<8x128xf32>
    %17 = arith.mulf %14, %16 : vector<8x128xf32>
    %cst_14 = arith.constant dense<0.000000e+00> : vector<8xf32>
    %18 = vector.multi_reduction <add>, %17, %cst_14 [1] : vector<8x128xf32> to vector<8xf32>
    %19 = vector.shape_cast %18 : vector<8xf32> to vector<8x1xf32>
    %c0_15 = arith.constant 0 : index
    %c0_16 = arith.constant 0 : index
    %20 = vector.load %arg7[%c0_15, %c0_16] : memref<1x1xf32, #tpu.memory_space<vmem>>, vector<1x1xf32>
    %21 = vector.broadcast %20 : vector<1x1xf32> to vector<8x1xf32>
    %22 = arith.addf %19, %21 : vector<8x1xf32>
    %23 = math.tanh %22 : vector<8x1xf32>
    %c0_17 = arith.constant 0 : index
    %c0_18 = arith.constant 0 : index
    %24 = vector.load %arg8[%c0_17, %c0_18] : memref<8x1xf32, #tpu.memory_space<vmem>>, vector<8x1xf32>
    tpu.vector_store %arg8[%c0_17, %c0_18], %23 {strides = array<i32>} : memref<8x1xf32, #tpu.memory_space<vmem>>, vector<8x1xf32>,
    return
  }
  func.func @transform_0(%arg0: i32) -> (i32, i32) {
    %c0_i32 = arith.constant 0 : i32
    %c0_i32_0 = arith.constant 0 : i32
    return %arg0, %c0_i32 : i32, i32
  }
  func.func @transform_1(%arg0: i32) -> (i32, i32) {
    %c0_i32 = arith.constant 0 : i32
    %c0_i32_0 = arith.constant 0 : i32
    %c0_i32_1 = arith.constant 0 : i32
    return %c0_i32, %c0_i32_0 : i32, i32
  }
  func.func @transform_2(%arg0: i32) -> (i32, i32) {
    %c0_i32 = arith.constant 0 : i32
    %c0_i32_0 = arith.constant 0 : i32
    %c0_i32_1 = arith.constant 0 : i32
    return %c0_i32, %c0_i32_0 : i32, i32
  }
  func.func @transform_3(%arg0: i32) -> (i32, i32) {
    %c0_i32 = arith.constant 0 : i32
    %c0_i32_0 = arith.constant 0 : i32
    %c0_i32_1 = arith.constant 0 : i32
    return %c0_i32, %c0_i32_0 : i32, i32
  }
  func.func @transform_4(%arg0: i32) -> (i32, i32) {
    %c0_i32 = arith.constant 0 : i32
    %c0_i32_0 = arith.constant 0 : i32
    %c0_i32_1 = arith.constant 0 : i32
    return %c0_i32, %c0_i32_0 : i32, i32
  }
  func.func @transform_5(%arg0: i32) -> (i32, i32) {
    %c0_i32 = arith.constant 0 : i32
    %c0_i32_0 = arith.constant 0 : i32
    %c0_i32_1 = arith.constant 0 : i32
    return %c0_i32, %c0_i32_0 : i32, i32
  }
  func.func @transform_6(%arg0: i32) -> (i32, i32) {
    %c0_i32 = arith.constant 0 : i32
    %c0_i32_0 = arith.constant 0 : i32
    %c0_i32_1 = arith.constant 0 : i32
    return %c0_i32, %c0_i32_0 : i32, i32
  }
  func.func @transform_7(%arg0: i32) -> (i32, i32) {
    %c0_i32 = arith.constant 0 : i32
    %c0_i32_0 = arith.constant 0 : i32
    return %arg0, %c0_i32 : i32, i32
  }
}

</mosaic_0001>

<bundles_post_ra>
// kernel: value_head_forward.1
= control target key start
LH: loop header
LB: loop body
LE: loop exit
PB: predicated region body
PF: predicated region fallthrough
CT: control target
= control target key end

     0   :  { %s513_s0 = inlined_call_operand.vmem [shape: f32[8,32], index: 0, kind: input, shape index: {}]   ;;  %s514_s1 = inlined_call_operand.hbm [shape: f32[32,128], index: 1, kind: input, shape index: {}]   ;;  %s515_s2 = inlined_call_operand.vmem [shape: f32[1,128], index: 2, kind: input, shape index: {}]   ;;  %s516_s3 = inlined_call_operand.hbm [shape: f32[128,128], index: 3, kind: input, shape index: {}]   ;;  %s517_s4 = inlined_call_operand.vmem [shape: f32[1,128], index: 4, kind: input, shape index: {}]   ;;  %s518_s5 = inlined_call_operand.vmem [shape: f32[1,128], index: 5, kind: input, shape index: {}]   ;;  %s519_s6 = inlined_call_operand.<no memory space> [shape: f32[1,1], index: 6, kind: input, shape index: {}]   ;;  %s520_s7 = inlined_call_operand.vmem [shape: f32[8,1], index: 7, kind: output, shape index: {}]  }
   0x1   :  { %v12_v0 = vstv %s519_s6 }
   0x2   :  { %13 = vst [vmem:[#allocation2] sm:$0x1] %v12_v0 }
   0x3   :  { %14 = vsyncpa [#allocation4], 0 }
   0x4   :  { %15 = vsyncpa [#allocation6], 0  ;;  %s424_s26 = smov [#allocation3]   ;;  %s376_s30 = scalar_lea.hbm %s514_s1, 512 }
   0x5   :  { %s23_s27 = sshll.u32 %s424_s26, 4  ;;  %p377_p0 = scmp.ne.s32.totalorder %s514_s1, %s376_s30  ;;  %s24_s27 = int_to_ptr.vmem [resolvable:$true] %s23_s27 }
   0x6   :  { %p380_p1 = scmp.lt.u32.totalorder %s376_s30, %s514_s1 }
   0x8   :  { %p382_p2 = pnand %p380_p1, %p377_p0 }
   0xa   :  { %385 = shalt.err (!%p382_p2)
}
   0xb   :  { %s386_s6 = scalar_lea.vmem %s24_s27, 512  ;;  %p391_p4 = scmp.lt.s32.totalorder %s24_s27, %s24_s27 }
   0xc   :  { %p387_p3 = scmp.ne.s32.totalorder %s24_s27, %s386_s6  ;;  %p392_p5 = scmp.lt.s32.totalorder %s386_s6, %s386_s6 }
   0xe   :  { %p393_p6 = por %p392_p5, %p391_p4 }
  0x10   :  { %p394_p7 = pnand %p393_p6, %p387_p3 }
  0x12   :  { %397 = shalt.err (!%p394_p7)
}
  0x13   :  { %s425_s12 = smov 128   ;;  %s426_s13 = smov 8  }
  0x14   :  { %29 = dma.hbm_to_vmem [thread:$0]  %s514_s1, 512, %s24_s27, [#allocation4], %s425_s12, %s425_s12, %s426_s13  }
  0x15   :  { %s427_s16 = smov [#allocation5]   ;;  %s398_s20 = scalar_lea.hbm %s516_s3, 2048 }
  0x16   :  { %s37_s17 = sshll.u32 %s427_s16, 4  ;;  %p399_p8 = scmp.ne.s32.totalorder %s516_s3, %s398_s20  ;;  %s38_s17 = int_to_ptr.vmem [resolvable:$true] %s37_s17 }
  0x17   :  { %p402_p9 = scmp.lt.u32.totalorder %s398_s20, %s516_s3 }
  0x19   :  { %p404_p10 = pnand %p402_p9, %p399_p8 }
  0x1b   :  { %407 = shalt.err (!%p404_p10)
}
  0x1c   :  { %s408_s25 = scalar_lea.vmem %s38_s17, 2048  ;;  %p413_p12 = scmp.lt.s32.totalorder %s38_s17, %s38_s17 }
  0x1d   :  { %p409_p11 = scmp.ne.s32.totalorder %s38_s17, %s408_s25  ;;  %p414_p13 = scmp.lt.s32.totalorder %s408_s25, %s408_s25 }
  0x1f   :  { %p415_p0 = por %p414_p13, %p413_p12 }
  0x21   :  { %p416_p1 = pnand %p415_p0, %p409_p11 }
  0x23   :  { %419 = shalt.err (!%p416_p1)
}
  0x24   :  { %43 = dma.hbm_to_vmem [thread:$0]  %s516_s3, 2048, %s38_s17, [#allocation6], %s425_s12, %s425_s12, %s426_s13  }
  0x25   :  { %420 = dma.done.wait [#allocation4], 512  }
  0x26   :  { %421 = vsyncadd [#allocation4], 4294966784 }
  0x27   :  { %422 = dma.done.wait [#allocation6], 2048  }
  0x28   :  { %423 = vsyncadd [#allocation6], 4294965248  ;;  %v428_v1 = vmov 0.0|0.0   ;;  %vm429_vm0 = vmmov 0   ;;  %v430_v2 = vmov 0.0   ;;  %v57_v3 = vld [vmem:[#allocation3] sm:$0xff] }
  0x29   :  { %337 = vmatprep.subr.bf16.mxu0 %v428_v1  ;;  %299 = vmatprep.mubr.msk.f32.mxu0 %vm429_vm0, %v430_v2  ;;  %v58_v4 = vld [vmem:[#allocation3 + $0x8] sm:$0xff]  ;;  %v59_v5 = vld [vmem:[#allocation3 + $0x10] sm:$0xff]  ;;  %v60_v7 = vld [vmem:[#allocation3 + $0x18] sm:$0xff]  ;;  %vm68_vm1 = vcmask 261120   ;;  %vm256_vm2 = vcmask 7168  }
  0x2a   :  { %343 = vmatprep.subr.bf16.mxu1 %v428_v1  ;;  %334 = vmatprep.mubr.msk.f32.mxu1 %vm429_vm0, %v430_v2  ;;  %v338_v6 = vpack.c.bf16 %v58_v4, %v57_v3  ;;  %v143_v8 = vld [vmem:[#allocation5] sm:$0xff]  ;;  %v144_v9 = vld [vmem:[#allocation5 + $0x8] sm:$0xff]  ;;  %v145_v10 = vld [vmem:[#allocation5 + $0x10] sm:$0xff]  ;;  %v341_v12 = vpack.c.bf16 %v60_v7, %v59_v5 }
  0x2b   :  { %v146_v11 = vld [vmem:[#allocation5 + $0x18] sm:$0xff]  ;;  %v344_v13 = vpack.c.bf16 %v144_v9, %v143_v8  ;;  %v147_v15 = vld [vmem:[#allocation5 + $0x20] sm:$0xff]  ;;  %v148_v16 = vld [vmem:[#allocation5 + $0x28] sm:$0xff] }
  0x2c   :  { %339 = vmatpush3.bf16.msra.mxu0 %v338_v6  ;;  %v347_v14 = vpack.c.bf16 %v146_v11, %v145_v10  ;;  %v56_v17 = vld [vmem:[%s513_s0] sm:$0xff]  ;;  %v350_v18 = vpack.c.bf16 %v148_v16, %v147_v15  ;;  %v149_v19 = vld [vmem:[#allocation5 + $0x30] sm:$0xff]  ;;  %v152_v23 = vld [vmem:[#allocation5 + $0x48] sm:$0xff] }
  0x2d   :  { %340 = vmatprep.subr.bf16.mxu0 %v428_v1  ;;  %345 = vmatpush3.bf16.msra.mxu1 %v344_v13  ;;  %v150_v20 = vld [vmem:[#allocation5 + $0x38] sm:$0xff]  ;;  %v151_v22 = vld [vmem:[#allocation5 + $0x40] sm:$0xff]  ;;  %v153_v25 = vld [vmem:[#allocation5 + $0x50] sm:$0xff] }
  0x2e   :  { %346 = vmatprep.subr.bf16.mxu1 %v428_v1  ;;  %v353_v21 = vpack.c.bf16 %v150_v20, %v149_v19  ;;  %v356_v24 = vpack.c.bf16 %v152_v23, %v151_v22  ;;  %v154_v26 = vld [vmem:[#allocation5 + $0x58] sm:$0xff]  ;;  %v155_v28 = vld [vmem:[#allocation5 + $0x60] sm:$0xff]  ;;  %v156_v29 = vld [vmem:[#allocation5 + $0x68] sm:$0xff] }
  0x2f   :  { %v359_v27 = vpack.c.bf16 %v154_v26, %v153_v25  ;;  %v362_v30 = vpack.c.bf16 %v156_v29, %v155_v28  ;;  %v157_v31 = vld [vmem:[#allocation5 + $0x70] sm:$0xff]  ;;  %v158_v32 = vld [vmem:[#allocation5 + $0x78] sm:$0xff] }
  0x30   :  { %342 = vmatpush3.bf16.msra.mxu0 %v341_v12  ;;  %v365_v33 = vpack.c.bf16 %v158_v32, %v157_v31  ;;  %v264_v34 = vld [vmem:[%s515_s2] ss:$0 sm:$0xff] }
  0x31   :  { %348 = vmatpush3.bf16.msra.mxu1 %v347_v14  ;;  %v266_v39 = vld [vmem:[%s517_s4] ss:$0 sm:$0xff] }
  0x32   :  { %349 = vmatprep.subr.bf16.mxu1 %v428_v1  ;;  %v267_v43 = vld [vmem:[%s518_s5] ss:$0 sm:$0xff] }
  0x33   :  { %300 = vmatmul.mubr.msk.f32.vlgmr.msra.gmra.mrb[0].mxu0 %vm68_vm1, %v56_v17  ;;  %v268_v46 = vld [vmem:[#allocation2] ss:$0 sm:$0xff] }
  0x35   :  { %351 = vmatpush3.bf16.msra.mxu1 %v350_v18 }
  0x36   :  { %352 = vmatprep.subr.bf16.mxu1 %v428_v1 }
  0x39   :  { %354 = vmatpush3.bf16.msra.mxu1 %v353_v21 }
  0x3a   :  { %355 = vmatprep.subr.bf16.mxu1 %v428_v1 }
  0x3d   :  { %357 = vmatpush3.bf16.msra.mxu1 %v356_v24 }
  0x3e   :  { %358 = vmatprep.subr.bf16.mxu1 %v428_v1 }
  0x41   :  { %360 = vmatpush3.bf16.msra.mxu1 %v359_v27 }
  0x42   :  { %361 = vmatprep.subr.bf16.mxu1 %v428_v1 }
  0x45   :  { %363 = vmatpush3.bf16.msra.mxu1 %v362_v30 }
  0x46   :  { %364 = vmatprep.subr.bf16.mxu1 %v428_v1 }
  0x49   :  { %366 = vmatpush3.bf16.msra.mxu1 %v365_v33 }
 0x106   :  { %v138_v35 = vpop.f32.mrb[0].mxu0 }
 0x107   :  { %v139_v36 = vadd.f32 %v264_v34, %v138_v35  ;;  %v301_v37 = vpop.f32.mrb[1].mxu0 }
 0x109   :  { %v142_v38 = vmax.f32 %v139_v36, 0.0 }
 0x10b   :  { %335 = vmatmul.mubr.f32.vlgmr.msra.gmra.mrb[0].mxu1 %v142_v38 }
 0x1de   :  { %v232_v40 = vpop.f32.mrb[0].mxu1 }
 0x1df   :  { %v233_v41 = vadd.f32 %v266_v39, %v232_v40  ;;  %v336_v42 = vpop.f32.mrb[1].mxu1 }
 0x1e1   :  { %v236_v44 = vmax.f32 %v233_v41, 0.0 }
 0x1e3   :  { %v244_v45 = vmul.f32 %v267_v43, %v236_v44 }
 0x1e5   :  { %245 = vadd.xlane.f32.xlu0 %v244_v45 }
 0x272   :  { %v246_v47 = vpop.xlane.xlu0 %245 }
 0x273   :  { %v254_v48 = vadd.f32 %v268_v46, %v246_v47 }
 0x275   :  { %374 = vtanh.f32 %v254_v48 }
 0x27f   :  { %v375_v49 = vpop.eup %374 }
 0x280   :  { %257 = vst.msk [vmem:[%s520_s7] sm:$0xff] %vm256_vm2, %v375_v49 }
 0x281   :  { %262 = vsyncpa [#allocation4], 1 }
 0x282   :  { %263 = vsyncpa [#allocation6], 1 }

</bundles_post_ra>
